<compile_context>
chip_gen: v5e
topology: v5e:2x2
jax: 0.10.0
libtpu: 0.0.40
codegen_flags: <defaults>
</compile_context>

<pallas_src>
import functools
import math

import jax
import jax.numpy as jnp
from jax.experimental import pallas as pl
from jax.experimental.pallas import tpu as pltpu

EPS = 1e-5  # torch.nn.LayerNorm default eps

BLOCK_PARAM_NAMES = (
    'ln1_w', 'ln1_b', 'wq', 'bq', 'wk', 'bk', 'wv', 'bv', 'wp', 'bp',
    'ln2_w', 'ln2_b', 'w1', 'b1', 'w2', 'b2',
)


def _layer_norm(x, w, b):
    # Single-pass mean/variance (sum & sum-of-squares), biased, like torch LayerNorm.
    inv_d = 1.0 / x.shape[-1]
    mu = jnp.sum(x, axis=-1, keepdims=True) * inv_d
    ex2 = jnp.sum(x * x, axis=-1, keepdims=True) * inv_d
    var = ex2 - mu * mu
    return (x - mu) * jax.lax.rsqrt(var + EPS) * w + b


def _gelu_tanh(x):
    # TODO(synk): PyTorch nn.GELU() default is exact erf; the tanh approximation
    # (EUP slot) deviates by ~1e-3 max abs — acceptable for inference.
    c = 0.7978845608028654  # sqrt(2/pi)
    return 0.5 * x * (1.0 + jnp.tanh(c * (x + 0.044715 * x * x * x)))


# --------------------------- patch-embedding kernel ------------------------- #

def patch_embed_kernel(p_ref, w_ref, b_ref, o_ref):
    tb, L, P = p_ref.shape
    tokens = jnp.dot(p_ref[...].reshape(tb * L, P), w_ref[...],
                     preferred_element_type=jnp.float32) + b_ref[...]
    o_ref[...] = tokens.reshape(o_ref.shape)


# ----------------------------- transformer kernel --------------------------- #

def encoder_kernel(x0_ref,
                   ln1w, ln1b, wq, bq, wk, bk, wv, bv, wp, bp,
                   ln2w, ln2b, w1, b1, w2, b2,
                   nw, nb, dw, db,
                   dec_o_ref, acc_ref, *, num_heads):
    layer = pl.program_id(1)
    n_layers = pl.num_programs(1)

    tb, L, D = x0_ref.shape
    dh = D // num_heads
    M = tb * L

    # layer 0 of each batch tile: load the embedded tokens into the resident
    # residual-stream scratch (x0 block index is constant over the layer axis,
    # so Pallas fetches it from HBM only once per batch tile).
    @pl.when(layer == 0)
    def _():
        acc_ref[...] = x0_ref[...].reshape(acc_ref.shape)

    x = acc_ref[...]                                   # (Tb*L, D) f32

    # ---- attention branch: x + proj(MHA(LN1(x))) ----
    hn = _layer_norm(x, ln1w[0], ln1b[0]).astype(jnp.bfloat16)
    # 1/sqrt(dh) is pre-folded into wq/bq at init time.
    q = (jnp.dot(hn, wq[0], preferred_element_type=jnp.float32) + bq[0]).astype(jnp.bfloat16)
    k = (jnp.dot(hn, wk[0], preferred_element_type=jnp.float32) + bk[0]).astype(jnp.bfloat16)
    v = (jnp.dot(hn, wv[0], preferred_element_type=jnp.float32) + bv[0]).astype(jnp.bfloat16)

    def split_heads(t):
        # (Tb*L, D) -> (Tb*H, L, dh); merged leading batch dim for the 3-D einsums.
        # TODO(synk): if lower_as_mlir shows materialized copies here, switch to
        # pltpu.einshape / pre-reshaped per-head weights to avoid the relayout.
        return (t.reshape(tb, L, num_heads, dh).swapaxes(1, 2)
                 .reshape(tb * num_heads, L, dh))

    qh, kh, vh = split_heads(q), split_heads(k), split_heads(v)

    att = jnp.einsum('bqd,bkd->bqk', qh, kh,
                     preferred_element_type=jnp.float32)            # (Tb*H, L, L) f32
    att = jnp.exp(att - jnp.max(att, axis=-1, keepdims=True))
    att = att * pl.reciprocal(jnp.sum(att, axis=-1, keepdims=True), approx=True)
    ctx = jnp.einsum('bqk,bkd->bqd', att.astype(jnp.bfloat16), vh,
                     preferred_element_type=jnp.float32)            # (Tb*H, L, dh)
    attn_out = (ctx.astype(jnp.bfloat16)
                .reshape(tb, num_heads, L, dh).swapaxes(1, 2).reshape(M, D))

    x = x + jnp.dot(attn_out, wp[0], preferred_element_type=jnp.float32) + bp[0]

    # ---- MLP branch: x + fc2(GELU(fc1(LN2(x)))) ----
    h2 = _layer_norm(x, ln2w[0], ln2b[0]).astype(jnp.bfloat16)
    m = jnp.dot(h2, w1[0], preferred_element_type=jnp.float32) + b1[0]
    m = _gelu_tanh(m).astype(jnp.bfloat16)
    x = x + jnp.dot(m, w2[0], preferred_element_type=jnp.float32) + b2[0]
    acc_ref[...] = x

    # ---- after the last block: final self.norm + self.decoder_embed ----
    @pl.when(layer == n_layers - 1)
    def _():
        hf = _layer_norm(x, nw[...], nb[...]).astype(jnp.bfloat16)
        dec = jnp.dot(hf, dw[...], preferred_element_type=jnp.float32) + db[...]
        dec_o_ref[...] = dec.reshape(dec_o_ref.shape)


# ------------------------------- wrappers ----------------------------------- #

def _nbytes(shape, dtype):
    return math.prod(shape) * jnp.dtype(dtype).itemsize


def _vmem_cap_bytes():
    # Generation-aware physical VMEM (64 MiB/TC on v7x, 128 MiB on v5e/v6e).
    try:
        info = pltpu.get_tpu_info()
        cap = int(getattr(info, 'vmem_capacity_bytes', 0) or 0)
        if cap > 0:
            return cap
    except Exception:
        pass
    return 64 << 20   # conservative fallback (v7x per-core VMEM)


def _const_spec(arr):
    nd = arr.ndim
    return pl.BlockSpec(arr.shape, lambda b, l, _nd=nd: (0,) * _nd)


def _layer_spec(arr):
    nd = arr.ndim
    return pl.BlockSpec((1,) + arr.shape[1:],
                        lambda b, l, _nd=nd: (l,) + (0,) * (_nd - 1))


def _patch_embed(patches_b, emb_w_b, emb_b, tb, vmem_limit):
    B, L, Pp = patches_b.shape
    D = emb_w_b.shape[1]
    return pl.pallas_call(
        patch_embed_kernel,
        out_shape=jax.ShapeDtypeStruct((B, L, D), jnp.float32),
        grid=(B // tb,),
        in_specs=[pl.BlockSpec((tb, L, Pp), lambda b: (b, 0, 0)),
                  pl.BlockSpec(emb_w_b.shape, lambda b: (0, 0)),
                  pl.BlockSpec(emb_b.shape, lambda b: (0, 0))],
        out_specs=pl.BlockSpec((tb, L, D), lambda b: (b, 0, 0)),
        compiler_params=pltpu.CompilerParams(
            dimension_semantics=("parallel",),
            vmem_limit_bytes=vmem_limit),
    )(patches_b, emb_w_b, emb_b)


def vision_encoder_forward(x, params, *, patch_size, num_heads, batch_tile=None):
    """x: (B, C, H, W) float32, NCHW like PyTorch.  Returns
    (embed_x, restored_masked_x, mask, pixel_emb) for the pos/pixel/mask=None path."""
    B, C, H, W = x.shape
    p = patch_size
    h, w = H // p, W // p
    L = h * w
    # NCHW -> (B, L, C*p*p) patch vectors in (c, ph, pw) order, matching
    # Conv2d(kernel=stride=p) followed by flatten(2).transpose(1, 2).
    patches = (x.reshape(B, C, h, p, w, p)
                .transpose(0, 2, 4, 1, 3, 5)
                .reshape(B, L, C * p * p))

    blocks = params['blocks']
    depth = blocks['wq'].shape[0]
    D = params['emb_w'].shape[1]
    Ddec = params['dec_w'].shape[1]
    Dm = blocks['w1'].shape[2]

    # bf16 patch-embed operands with the contraction dim padded to a lane-dense
    # multiple of 128 (zero rows contribute nothing to the dot product).
    P = patches.shape[-1]
    Pp = max(128, ((P + 127) // 128) * 128)
    patches_b = jnp.pad(patches.astype(jnp.bfloat16), ((0, 0), (0, 0), (0, Pp - P)))
    emb_w_b = jnp.pad(params['emb_w'].astype(jnp.bfloat16), ((0, Pp - P), (0, 0)))
    emb_b = params['emb_b']

    block_args = [blocks[n] for n in BLOCK_PARAM_NAMES]
    head_args = [params[n] for n in ('norm_w', 'norm_b', 'dec_w', 'dec_b')]

    per_layer_bytes = sum(_nbytes(a.shape[1:], a.dtype) for a in block_args)
    head_bytes = sum(_nbytes(a.shape, a.dtype) for a in head_args)

    def footprint(tb):
        f = 2 * _nbytes((tb, L, D), jnp.float32)        # embed-token input block (2 bufs)
        f += 2 * per_layer_bytes                         # per-layer weight slab (2 bufs)
        f += 2 * head_bytes                              # final norm / decoder weights
        f += 2 * _nbytes((tb, L, Ddec), jnp.float32)     # output block (2 bufs)
        f += _nbytes((tb, L, D), jnp.float32)            # residual-stream scratch
        f += tb * num_heads * L * L * (4 + 2)            # attn scores f32 + probs bf16
        f += tb * L * Dm * 4                             # MLP hidden f32
        return f

    cap = _vmem_cap_bytes()
    cap_eff = min(cap - (8 << 20), 112 << 20)            # ~56 MiB on v7x, ~112 MiB on v5e/v6e
    headroom = 12 << 20                                  # compiler internal scratch / temps

    if batch_tile is None:
        divisors = [t for t in range(B, 0, -1) if B % t == 0]
        tb = None
        # Prefer >= 2 batch tiles so the "parallel" axis can feed both v7x TensorCores.
        for t in divisors:
            if B // t >= 2 and footprint(t) + headroom <= cap_eff:
                tb = t
                break
        if tb is None:
            for t in divisors:
                if footprint(t) + headroom <= cap_eff:
                    tb = t
                    break
        if tb is None:
            tb = 1
    else:
        tb = batch_tile
    assert B % tb == 0, "batch must be divisible by the batch tile"

    vmem_limit = int(min(max(footprint(tb) + headroom, 32 << 20), cap_eff))

    # ---- stage 1: patch embedding (also the returned `embed_x`) ----
    embed_x = _patch_embed(patches_b, emb_w_b, emb_b, tb, vmem_limit)

    # ---- stage 2: fused transformer blocks + final norm + decoder_embed ----
    args = [embed_x] + block_args + head_args
    in_specs = ([pl.BlockSpec((tb, L, D), lambda b, l: (b, 0, 0))]
                + [_layer_spec(a) for a in block_args]
                + [_const_spec(a) for a in head_args])
    out_specs = pl.BlockSpec((tb, L, Ddec), lambda b, l: (b, 0, 0))
    out_shape = jax.ShapeDtypeStruct((B, L, Ddec), jnp.float32)

    kernel = functools.partial(encoder_kernel, num_heads=num_heads)
    decoded = pl.pallas_call(
        kernel,
        out_shape=out_shape,
        grid=(B // tb, depth),
        in_specs=in_specs,
        out_specs=out_specs,
        scratch_shapes=[pltpu.VMEM((tb * L, D), jnp.float32)],
        compiler_params=pltpu.CompilerParams(
            dimension_semantics=("parallel", "arbitrary"),
            vmem_limit_bytes=vmem_limit),
    )(*args)

    # TODO(synk): mask!=None / pos!=None / pixel_emb!=None branches (boolean-mask
    # gather of a ragged token subset + scatter restore with mask_token) are not
    # implemented; only the default (all-None) forward path is reproduced here.
    return embed_x, decoded, None, None


# ------------------------------ parameters ---------------------------------- #

def init_params(key, *, in_chans, patch_size, embed_dim, decoder_embed_dim,
                depth, mlp_ratio, num_heads):
    P = in_chans * patch_size * patch_size
    D = embed_dim
    Dm = int(embed_dim * mlp_ratio)
    scale = (D // num_heads) ** (-0.5)
    keys = iter(jax.random.split(key, 2 + 6 * depth))

    def xav(k, fi, fo, dtype=jnp.float32, mult=1.0):
        lim = (6.0 / (fi + fo)) ** 0.5
        w = jax.random.uniform(k, (fi, fo), jnp.float32, -lim, lim) * mult
        return w.astype(dtype)

    params = {
        # SPEmb conv weight viewed (D, C*p*p), xavier-init, stored transposed (P, D).
        'emb_w': xav(next(keys), P, D),
        'emb_b': jnp.zeros((1, D), jnp.float32),
        'norm_w': jnp.ones((1, D), jnp.float32),
        'norm_b': jnp.zeros((1, D), jnp.float32),
        # decoder_embed has bias=False when args.qkv_bias=True; zero bias is equivalent.
        'dec_w': xav(next(keys), D, decoder_embed_dim, jnp.bfloat16),
        'dec_b': jnp.zeros((1, decoder_embed_dim), jnp.float32),
    }

    per_layer = {n: [] for n in BLOCK_PARAM_NAMES}
    for _ in range(depth):
        per_layer['ln1_w'].append(jnp.ones((1, D), jnp.float32))
        per_layer['ln1_b'].append(jnp.zeros((1, D), jnp.float32))
        # 1/sqrt(head_dim) attention scale folded into the q projection (weight + bias).
        per_layer['wq'].append(xav(next(keys), D, D, jnp.bfloat16, mult=scale))
        per_layer['bq'].append(jnp.zeros((1, D), jnp.float32))   # 0 * scale == 0
        per_layer['wk'].append(xav(next(keys), D, D, jnp.bfloat16))
        per_layer['bk'].append(jnp.zeros((1, D), jnp.float32))
        per_layer['wv'].append(xav(next(keys), D, D, jnp.bfloat16))
        per_layer['bv'].append(jnp.zeros((1, D), jnp.float32))
        per_layer['wp'].append(xav(next(keys), D, D, jnp.bfloat16))
        per_layer['bp'].append(jnp.zeros((1, D), jnp.float32))
        per_layer['ln2_w'].append(jnp.ones((1, D), jnp.float32))
        per_layer['ln2_b'].append(jnp.zeros((1, D), jnp.float32))
        per_layer['w1'].append(xav(next(keys), D, Dm, jnp.bfloat16))
        per_layer['b1'].append(jnp.zeros((1, Dm), jnp.float32))
        per_layer['w2'].append(xav(next(keys), Dm, D, jnp.bfloat16))
        per_layer['b2'].append(jnp.zeros((1, D), jnp.float32))
    # stack per-layer params along a leading `depth` axis for the layer grid axis
    params['blocks'] = {n: jnp.stack(v) for n, v in per_layer.items()}
    return params


# --------------------------------- demo ------------------------------------- #

if __name__ == "__main__":
    # small, forward-consistent, lane-dense shapes (>= 2 batch tiles after tiling)
    B, C_IN, H, W = 4, 4, 16, 16
    PATCH = 1                  # -> L = 256 tokens
    EMBED_DIM = 256
    DECODER_EMBED_DIM = 256
    DEPTH = 2
    NUM_HEADS = 2              # head_dim = 128 -> MXU-aligned head contractions
    MLP_RATIO = 2              # module default mlp_ratio

    root = jax.random.PRNGKey(0)
    k_param, k_input = jax.random.split(root)
    params = init_params(k_param, in_chans=C_IN, patch_size=PATCH,
                         embed_dim=EMBED_DIM, decoder_embed_dim=DECODER_EMBED_DIM,
                         depth=DEPTH, mlp_ratio=MLP_RATIO, num_heads=NUM_HEADS)
    x = jax.random.normal(k_input, (B, C_IN, H, W), jnp.float32)

    embed_x, out, mask, pixel_emb = vision_encoder_forward(
        x, params, patch_size=PATCH, num_heads=NUM_HEADS)
    jax.block_until_ready((embed_x, out))

    L = (H // PATCH) * (W // PATCH)
    assert embed_x.shape == (B, L, EMBED_DIM)
    assert out.shape == (B, L, DECODER_EMBED_DIM)
    assert bool(jnp.all(jnp.isfinite(embed_x))) and bool(jnp.all(jnp.isfinite(out)))
    print("KERNEL_OK")
</pallas_src>

<mosaic_0001>
module attributes {stable_mosaic.version = 11 : i64} {
  func.func @patch_embed_kernel(%arg0: i32, %arg1: memref<2x256x128xbf16, #tpu.memory_space<vmem>>, %arg2: memref<128x256xbf16, #tpu.memory_space<vmem>>, %arg3: memref<1x256xf32, #tpu.memory_space<vmem>>, %arg4: memref<2x256x256xf32, #tpu.memory_space<vmem>>) attributes {dimension_semantics = [#tpu.dimension_semantics<parallel>], iteration_bounds = array<i64: 2>, scalar_prefetch = 0 : i64, scratch_operands = 0 : i64, tpu.core_type = #tpu.core_type<tc>, window_params = [{transform_indices = @transform_0, window_bounds = array<i64: 2, 256, 128>}, {pipeline_mode = #tpu.pipeline_mode<synchronous>, transform_indices = @transform_1, window_bounds = array<i64: 128, 256>}, {pipeline_mode = #tpu.pipeline_mode<synchronous>, transform_indices = @transform_2, window_bounds = array<i64: 1, 256>}, {transform_indices = @transform_3, window_bounds = array<i64: 2, 256, 256>}]} {
    %c0 = arith.constant 0 : index
    %c0_0 = arith.constant 0 : index
    %c0_1 = arith.constant 0 : index
    %0 = vector.load %arg1[%c0, %c0_0, %c0_1] : memref<2x256x128xbf16, #tpu.memory_space<vmem>>, vector<2x256x128xbf16>
    %1 = vector.shape_cast %0 : vector<2x256x128xbf16> to vector<512x128xbf16>
    %c0_2 = arith.constant 0 : index
    %c0_3 = arith.constant 0 : index
    %2 = vector.load %arg2[%c0_2, %c0_3] : memref<128x256xbf16, #tpu.memory_space<vmem>>, vector<128x256xbf16>
    %cst = arith.constant dense<0.000000e+00> : vector<512x256xf32>
    %3 = tpu.matmul %1, %2, %cst {dimension_numbers = #tpu.dot_dimension_numbers<[1], [0], [0], [1], [0, 0, 1, 1], [], []>} : vector<512x128xbf16>, vector<128x256xbf16>, vector<512x256xf32> -> vector<512x256xf32>
    %c0_4 = arith.constant 0 : index
    %c0_5 = arith.constant 0 : index
    %4 = vector.load %arg3[%c0_4, %c0_5] : memref<1x256xf32, #tpu.memory_space<vmem>>, vector<1x256xf32>
    %5 = vector.broadcast %4 : vector<1x256xf32> to vector<512x256xf32>
    %6 = arith.addf %3, %5 : vector<512x256xf32>
    %7 = vector.shape_cast %6 : vector<512x256xf32> to vector<2x256x256xf32>
    %c0_6 = arith.constant 0 : index
    %c0_7 = arith.constant 0 : index
    %c0_8 = arith.constant 0 : index
    %8 = vector.load %arg4[%c0_6, %c0_7, %c0_8] : memref<2x256x256xf32, #tpu.memory_space<vmem>>, vector<2x256x256xf32>
    tpu.vector_store %arg4[%c0_6, %c0_7, %c0_8], %7 {strides = array<i32>} : memref<2x256x256xf32, #tpu.memory_space<vmem>>, vector<2x256x256xf32>,
    return
  }
  func.func @transform_0(%arg0: i32) -> (i32, i32, i32) {
    %c0_i32 = arith.constant 0 : i32
    %c0_i32_0 = arith.constant 0 : i32
    %c0_i32_1 = arith.constant 0 : i32
    return %arg0, %c0_i32, %c0_i32_0 : i32, i32, i32
  }
  func.func @transform_1(%arg0: i32) -> (i32, i32) {
    %c0_i32 = arith.constant 0 : i32
    %c0_i32_0 = arith.constant 0 : i32
    %c0_i32_1 = arith.constant 0 : i32
    return %c0_i32, %c0_i32_0 : i32, i32
  }
  func.func @transform_2(%arg0: i32) -> (i32, i32) {
    %c0_i32 = arith.constant 0 : i32
    %c0_i32_0 = arith.constant 0 : i32
    %c0_i32_1 = arith.constant 0 : i32
    return %c0_i32, %c0_i32_0 : i32, i32
  }
  func.func @transform_3(%arg0: i32) -> (i32, i32, i32) {
    %c0_i32 = arith.constant 0 : i32
    %c0_i32_0 = arith.constant 0 : i32
    %c0_i32_1 = arith.constant 0 : i32
    return %arg0, %c0_i32, %c0_i32_0 : i32, i32, i32
  }
}

</mosaic_0001>

<bundles_post_ra>
// kernel: tpu_custom_call.1
= control target key start
LH: loop header
LB: loop body
LE: loop exit
PB: predicated region body
PF: predicated region fallthrough
CT: control target
= control target key end

     0   :  { %8 = vsyncpa [#allocation3], 0  ;;  %s2140_s0 = inlined_call_operand.hbm [shape: bf16[4,256,128], index: 0, kind: input, shape index: {}]   ;;  %s2141_s1 = inlined_call_operand.hbm [shape: bf16[128,256], index: 1, kind: input, shape index: {}]   ;;  %s2142_s2 = inlined_call_operand.hbm [shape: f32[1,256], index: 2, kind: input, shape index: {}]   ;;  %s2143_s3 = inlined_call_operand.hbm [shape: f32[4,256,256], index: 3, kind: output, shape index: {}]  }
   0x1   :  { %10 = vsyncpa [#allocation3 + $0x1], 0 }
   0x2   :  { %11 = vsyncpa [#allocation6], 0 }
   0x3   :  { %12 = vsyncpa [#allocation4], 0 }
   0x4   :  { %14 = vsyncpa [#allocation4 + $0x1], 0  ;;  %s1701_s12 = smov 0   ;;  %s1703_s13 = smov 0  }
   0x5   :  { %s1705_s14 = smov 0   ;;  %s1707_s15 = smov 0  }
   0x6 LB: > { %s1722_s16 = sadd.s32 4294967295, %s1671_s15   ;;  %s1158_s17 = sadd.s32 4294967294, %s1671_s15   ;;  %s1671_s15 = sphi %s1707_s15, %s2153_s15   ;;  %s1667_s14 = sphi %s1705_s14, %s2152_s14   ;;  %s1663_s13 = sphi %s1703_s13, %s2151_s13   ;;  %s1659_s12 = sphi %s1701_s12, %s2150_s12  }
   0x7   : > { %p40_p0 = scmp.ne.s32.totalorder %s1663_s13, %s1659_s12  ;;  %p41_p1 = scmp.eq.s32.totalorder %s1722_s16, 0 }
   0x8   : > { %p106_p2 = scmp.eq.s32.totalorder %s1722_s16, 1  ;;  %p112_p3 = scmp.eq.s32.totalorder %s1158_s17, 1 }
   0x9   : > { %p1731_p4 = por %p41_p1, %p40_p0  ;;  %p1159_p5 = scmp.ge.s32.totalorder %s1671_s15, 1 }
   0xa   : > { %p1736_p6 = por %p112_p3, %p40_p0  ;;  %p119_p7 = scmp.lt.s32.totalorder %s1671_s15, 3 }
   0xb   : > { %s130_s22 = sshll.u32 %s2141_s1, 4  ;;  %s1673_s24 = smov [#allocation5]   ;;  %s131_s22 = int_to_ptr.hbm [resolvable:$true] %s130_s22 }
   0xc   : > { %p1744_p8 = pnand %p1159_p5, %p119_p7  ;;  %s132_s25 = sshll.u32 %s1673_s24, 4  ;;  %s133_s25 = int_to_ptr.vmem [resolvable:$true] %s132_s25 }
   0xd   : > { %s145_s28 = sshll.u32 %s2142_s2, 4  ;;  %s1674_s29 = smov 128   ;;  %s146_s28 = int_to_ptr.hbm [resolvable:$true] %s145_s28 }
   0xe   : > { %p1450_p9 = pneg %p1744_p8  ;;  %s1675_s30 = smov 8  }
   0xf   : > { %s1676_s4 = smov [#allocation7]   ;;  %s1757_s6 = sadd.s32 1, %s1671_s15  }
  0x10   : > { %p1451_p10 = pnand %p1450_p9, %p41_p1  ;;  %s147_s5 = sshll.u32 %s1676_s4, 4  ;;  %s148_s5 = int_to_ptr.vmem [resolvable:$true] %s147_s5 }
  0x11   : > { %s27_s7 = sadd.s32 1, %s1667_s14  ;;  %s24_s8 = ssub.s32 %s1671_s15, %s1757_s6 }
  0x12   : > { %1453 = dma.hbm_to_vmem [thread:$0]  (!%p1451_p10), %s131_s22, 2048, %s133_s25, [#allocation6], %s1674_s29, %s1674_s29, %s1675_s30  }
  0x13   : > { %1456 = dma.hbm_to_vmem [thread:$0]  (!%p1451_p10), %s146_s28, 32, %s148_s5, [#allocation6]  }
  0x14   : > { %p34_p12 = scmp.ne.s32.totalorder %s1667_s14, %s1663_s13  ;;  %p25_p13 = scmp.eq.s32.totalorder %s24_s8, 0 }
  0x15   : > { %p35_p0 = scmp.eq.s32.totalorder %s1671_s15, 0  ;;  %p1467_p5 = scmp.lt.s32.totalorder %s1671_s15, 2 }
  0x16   : > { %p1767_p3 = por %p106_p2, %p34_p12  ;;  %s158_s11 = sand.u32 1, %s1667_s14  }
  0x17   : > { %s1773_s10 = scalar_select %p25_p13, %s1667_s14, %s27_s7  }
  0x18   : > { %p36_p7 = por %p35_p0, %p34_p12  ;;  %s1163_s17 = sshll.u32 %s158_s11, 8 }
  0x19   : > { %s1371_s20 = sshll.u32 %s1671_s15, 8  ;;  %s162_s25 = scalar_lea.vmem [#allocation2], %s1163_s17 }
  0x1a   : > { %s168_s24 = scalar_lea.hbm %s2140_s0, %s1371_s20  ;;  %s171_s26 = sshll.u32 %s162_s25, 4  ;;  %s172_s26 = int_to_ptr.vmem [resolvable:$true] %s171_s26 }
  0x1b   : > { %s169_s27 = sshll.u32 %s168_s24, 4  ;;  %p1780_p2 = pnand %p1467_p5, %p36_p7  ;;  %s170_s27 = int_to_ptr.hbm [resolvable:$true] %s169_s27 }
  0x1c   : > { %s159_s29 = scalar_lea.sflag [#allocation3], %s158_s11  ;;  %s1571_s30 = sshra.s32 %s170_s27, 4  ;;  %s1572_s30 = int_to_ptr.hbm [resolvable:$true] %s1571_s30 }
  0x1d   : > { %s1573_s4 = scalar_lea.hbm %s1572_s30, 256  ;;  %p1575_p10 = pneg %p1780_p2 }
  0x1e   : > { %p1574_p9 = scmp.ne.s32.totalorder %s1572_s30, %s1573_s4  ;;  %s1578_s8 = scalar_lea.hbm %s2140_s0, 512 }
  0x1f   : > { %p1579_p0 = scmp.lt.s32.totalorder %s1572_s30, %s2140_s0  ;;  %p1580_p5 = scmp.lt.s32.totalorder %s1578_s8, %s1573_s4 }
  0x20   : > { %p1576_p12 = pnand %p1575_p10, %p1574_p9 }
  0x21   : > { %p1581_p7 = por %p1580_p5, %p1579_p0 }
  0x22   : > { %p1577_p13 = pneg %p1576_p12 }
  0x24   : > { %p1582_p11 = pnand %p1581_p7, %p1577_p13 }
  0x26   : > { %1585 = shalt.err (!%p1582_p11)
}
  0x27   : > { %s1677_s11 = smov 64   ;;  %s1678_s21 = smov 4  }
  0x28   : > { %1460 = dma.hbm_to_vmem [thread:$0]  (!%p1780_p2), %s170_s27, 4096, %s172_s26, %s159_s29, %s1677_s11, %s1677_s11, %s1678_s21  }
  0x29   : > { %183 = sbr.rel (%p1744_p8) target bundleno = 470 (0x1d6), region = 32  ;;  %s1797_s22 = sand.u32 (!%p1744_p8), 1, %s1663_s13  }
  0x2a   : > { %s1168_s24 = sshll.u32 (!%p1744_p8), %s1797_s22, 8  ;;  %s186_s25 = scalar_lea.sflag (!%p1744_p8), [#allocation3], %s1797_s22 }
  0x2b   : > { %s1801_s30 = scalar_lea.vmem (!%p1744_p8), [#allocation2], %s1168_s24 }
  0x2e   : > { %1646 = dma.done.wait (%p1731_p4), %s186_s25, 4096  }
  0x2f   : > { %1648 = vsyncadd (%p1731_p4), %s186_s25, 4294963200 }
  0x30   : > { %1650 = dma.done.wait (%p41_p1), [#allocation6], 2080  }
  0x31   : > { %1652 = vsyncadd (%p41_p1), [#allocation6], 4294965216  ;;  %v1358_v0 = vld [vmem:[#allocation5 + $0x70] sm:$0xf]  ;;  %v1419_v1 = vld [vmem:[#allocation5 + $0x74] sm:$0xf0] }
  0x32   : > { %v1418_v2 = vld [vmem:[#allocation5 + $0x74] sm:$0xf]  ;;  %v1359_v3 = vor.u32 %v1419_v1, %v1358_v0  ;;  %v1360_v4 = vld [vmem:[#allocation5 + $0x78] sm:$0xf0]  ;;  %v1350_v5 = vld [vmem:[#allocation5 + $0x60] sm:$0xf] }
  0x33   : > { %v1417_v6 = vld [vmem:[#allocation5 + $0x64] sm:$0xf0]  ;;  %v1363_v7 = vor.u32 %v1418_v2, %v1360_v4  ;;  %v1416_v8 = vld [vmem:[#allocation5 + $0x64] sm:$0xf]  ;;  %v1352_v9 = vld [vmem:[#allocation5 + $0x68] sm:$0xf0] }
  0x34   : > { %583 = vmatpush.bf16.msra.mxu0 %v1359_v3  ;;  %1422 = vmatpush.bf16.msra.mxu2 %v1359_v3  ;;  %v1351_v10 = vor.u32 %v1417_v6, %v1350_v5  ;;  %v1355_v11 = vor.u32 %v1416_v8, %v1352_v9  ;;  %v1342_v12 = vld [vmem:[#allocation5 + $0x50] sm:$0xf]  ;;  %v1415_v13 = vld [vmem:[#allocation5 + $0x54] sm:$0xf0]  ;;  %v1414_v14 = vld [vmem:[#allocation5 + $0x54] sm:$0xf] }
  0x35   : > { %752 = vmatpush.bf16.msra.mxu1 %v1363_v7  ;;  %1430 = vmatpush.bf16.msra.mxu3 %v1363_v7  ;;  %v1344_v15 = vld [vmem:[#allocation5 + $0x58] sm:$0xf0]  ;;  %v1343_v16 = vor.u32 %v1415_v13, %v1342_v12  ;;  %v1334_v18 = vld [vmem:[#allocation5 + $0x40] sm:$0xf]  ;;  %v1413_v19 = vld [vmem:[#allocation5 + $0x44] sm:$0xf0] }
  0x36   : > { %v1347_v17 = vor.u32 %v1414_v14, %v1344_v15  ;;  %v1412_v20 = vld [vmem:[#allocation5 + $0x44] sm:$0xf]  ;;  %v1336_v21 = vld [vmem:[#allocation5 + $0x48] sm:$0xf0]  ;;  %v1335_v22 = vor.u32 %v1413_v19, %v1334_v18  ;;  %v1326_v24 = vld [vmem:[#allocation5 + $0x30] sm:$0xf] }
  0x37   : > { %v1339_v23 = vor.u32 %v1412_v20, %v1336_v21  ;;  %v1411_v25 = vld [vmem:[#allocation5 + $0x34] sm:$0xf0]  ;;  %v1410_v26 = vld [vmem:[#allocation5 + $0x34] sm:$0xf]  ;;  %v1328_v27 = vld [vmem:[#allocation5 + $0x38] sm:$0xf0] }
  0x38   : > { %584 = vmatpush.bf16.msra.mxu0 %v1351_v10  ;;  %1423 = vmatpush.bf16.msra.mxu2 %v1351_v10  ;;  %v1327_v28 = vor.u32 %v1411_v25, %v1326_v24  ;;  %v1331_v29 = vor.u32 %v1410_v26, %v1328_v27  ;;  %v1318_v30 = vld [vmem:[#allocation5 + $0x20] sm:$0xf]  ;;  %v1409_v31 = vld [vmem:[#allocation5 + $0x24] sm:$0xf0]  ;;  %v1408_v32 = vld [vmem:[#allocation5 + $0x24] sm:$0xf] }
  0x39   : > { %753 = vmatpush.bf16.msra.mxu1 %v1355_v11  ;;  %1431 = vmatpush.bf16.msra.mxu3 %v1355_v11  ;;  %v1320_v33 = vld [vmem:[#allocation5 + $0x28] sm:$0xf0]  ;;  %v1319_v34 = vor.u32 %v1409_v31, %v1318_v30  ;;  %v1310_v36 = vld [vmem:[#allocation5 + $0x10] sm:$0xf]  ;;  %v1407_v37 = vld [vmem:[#allocation5 + $0x14] sm:$0xf0] }
  0x3a   : > { %v1323_v35 = vor.u32 %v1408_v32, %v1320_v33  ;;  %v1406_v38 = vld [vmem:[#allocation5 + $0x14] sm:$0xf]  ;;  %v1312_v39 = vld [vmem:[#allocation5 + $0x18] sm:$0xf0]  ;;  %v1311_v40 = vor.u32 %v1407_v37, %v1310_v36  ;;  %v1302_v42 = vld [vmem:[#allocation5] sm:$0xf] }
  0x3b   : > { %v1315_v41 = vor.u32 %v1406_v38, %v1312_v39  ;;  %v1405_v43 = vld [vmem:[#allocation5 + $0x4] sm:$0xf0]  ;;  %v1404_v44 = vld [vmem:[#allocation5 + $0x4] sm:$0xf]  ;;  %v1304_v45 = vld [vmem:[#allocation5 + $0x8] sm:$0xf0] }
  0x3c   : > { %585 = vmatpush.bf16.msra.mxu0 %v1343_v16  ;;  %1424 = vmatpush.bf16.msra.mxu2 %v1343_v16  ;;  %v1303_v46 = vor.u32 %v1405_v43, %v1302_v42  ;;  %v1307_v47 = vor.u32 %v1404_v44, %v1304_v45  ;;  %v1372_v48 = vld [vmem:[%s1801_s30] sm:$0xff]  ;;  %v1373_v50 = vld [vmem:[%s1801_s30 + $0x8] sm:$0xff]  ;;  %v1374_v52 = vld [vmem:[%s1801_s30 + $0x10] sm:$0xff]  ;;  %s1171_s18 = sshll.u32 %s1797_s22, 10  ;;  %s1421_s26 = sshll.u32 %s1722_s16, 10 }
  0x3d   : > { %754 = vmatpush.bf16.msra.mxu1 %v1347_v17  ;;  %1432 = vmatpush.bf16.msra.mxu3 %v1347_v17  ;;  %v1388_v49 = vld [vmem:[%s1801_s30 + $0x80] sm:$0xff]  ;;  %v1389_v51 = vld [vmem:[%s1801_s30 + $0x88] sm:$0xff]  ;;  %v1390_v53 = vld [vmem:[%s1801_s30 + $0x90] sm:$0xff]  ;;  %s1836_s23 = scalar_lea.vmem [#allocation8], %s1171_s18  ;;  %s1062_s29 = scalar_lea.hbm %s2143_s3, %s1421_s26 }
  0x3e   : > { %v1375_v54 = vld [vmem:[%s1801_s30 + $0x18] sm:$0xff]  ;;  %v1376_v56 = vld [vmem:[%s1801_s30 + $0x20] sm:$0xff]  ;;  %v1377_v58 = vld [vmem:[%s1801_s30 + $0x28] sm:$0xff]  ;;  %s1063_s16 = sshll.u32 %s1836_s23, 4  ;;  %s1065_s4 = sshll.u32 %s1062_s29, 4  ;;  %s1064_s16 = int_to_ptr.vmem [resolvable:$true] %s1063_s16  ;;  %s1066_s4 = int_to_ptr.hbm [resolvable:$true] %s1065_s4 }
  0x3f   : > { %v1391_v55 = vld [vmem:[%s1801_s30 + $0x98] sm:$0xff]  ;;  %v1392_v57 = vld [vmem:[%s1801_s30 + $0xa0] sm:$0xff]  ;;  %v1393_v59 = vld [vmem:[%s1801_s30 + $0xa8] sm:$0xff]  ;;  %s1050_s5 = scalar_lea.sflag [#allocation4], %s1797_s22  ;;  %s1615_s7 = sshra.s32 %s1066_s4, 4  ;;  %s1616_s7 = int_to_ptr.hbm [resolvable:$true] %s1615_s7 }
  0x40   : > { %586 = vmatpush.bf16.msra.mxu0 %v1335_v22  ;;  %1425 = vmatpush.bf16.msra.mxu2 %v1335_v22  ;;  %v1378_v60 = vld [vmem:[%s1801_s30 + $0x30] sm:$0xff]  ;;  %v1379_v62 = vld [vmem:[%s1801_s30 + $0x38] sm:$0xff]  ;;  %v305_v0 = vld [vmem:[#allocation7] sm:$0x3]  ;;  %s1617_s8 = scalar_lea.hbm %s1616_s7, 1024  ;;  %s1621_s11 = scalar_lea.hbm %s2143_s3, 2048 }
  0x41   : > { %755 = vmatpush.bf16.msra.mxu1 %v1339_v23  ;;  %1433 = vmatpush.bf16.msra.mxu3 %v1339_v23  ;;  %v1394_v61 = vld [vmem:[%s1801_s30 + $0xb0] sm:$0xff]  ;;  %v1395_v63 = vld [vmem:[%s1801_s30 + $0xb8] sm:$0xff]  ;;  %v1828_v1 = vperm.slane %v305_v0, 0  ;;  %v1830_v2 = vperm.slane %v305_v0, 1  ;;  %v1380_v3 = vld [vmem:[%s1801_s30 + $0x40] sm:$0xff]  ;;  %p1618_p1 = scmp.ne.s32.totalorder %s1616_s7, %s1617_s8  ;;  %p1622_p11 = scmp.lt.s32.totalorder %s1616_s7, %s2143_s3 }
  0x42   : > { %v1396_v4 = vld [vmem:[%s1801_s30 + $0xc0] sm:$0xff]  ;;  %v1381_v20 = vld [vmem:[%s1801_s30 + $0x48] sm:$0xff]  ;;  %v1382_v38 = vld [vmem:[%s1801_s30 + $0x50] sm:$0xff]  ;;  %p1623_p2 = scmp.lt.s32.totalorder %s1621_s11, %s1617_s8 }
  0x43   : > { %v1397_v21 = vld [vmem:[%s1801_s30 + $0xc8] sm:$0xff]  ;;  %v1398_v39 = vld [vmem:[%s1801_s30 + $0xd0] sm:$0xff]  ;;  %p1619_p4 = pnand %p1618_p1, %p1767_p3 }
  0x44   : > { %587 = vmatpush.bf16.msra.mxu0 %v1327_v28  ;;  %1426 = vmatpush.bf16.msra.mxu2 %v1327_v28  ;;  %p1624_p9 = por %p1623_p2, %p1622_p11 }
  0x45   : > { %756 = vmatpush.bf16.msra.mxu1 %v1331_v29  ;;  %1434 = vmatpush.bf16.msra.mxu3 %v1331_v29  ;;  %p1620_p8 = pneg %p1619_p4 }
  0x47   : > { %p1625_p10 = pnand %p1624_p9, %p1620_p8 }
  0x48   : > { %588 = vmatpush.bf16.msra.mxu0 %v1319_v34  ;;  %1427 = vmatpush.bf16.msra.mxu2 %v1319_v34 }
  0x49   : > { %757 = vmatpush.bf16.msra.mxu1 %v1323_v35  ;;  %1435 = vmatpush.bf16.msra.mxu3 %v1323_v35 }
  0x4c   : > { %589 = vmatpush.bf16.msra.mxu0 %v1311_v40  ;;  %1428 = vmatpush.bf16.msra.mxu2 %v1311_v40 }
  0x4d   : > { %758 = vmatpush.bf16.msra.mxu1 %v1315_v41  ;;  %1436 = vmatpush.bf16.msra.mxu3 %v1315_v41 }
  0x50   : > { %590 = vmatpush.bf16.msra.mxu0 %v1303_v46  ;;  %1429 = vmatpush.bf16.msra.mxu2 %v1303_v46 }
  0x51   : > { %759 = vmatpush.bf16.msra.mxu1 %v1307_v47  ;;  %1437 = vmatpush.bf16.msra.mxu3 %v1307_v47 }
  0x53   : > { %591 = vmatmul.bf16.vlgmr.msra.gmra.mxu0 %v1372_v48  ;;  %671 = vmatmul.bf16.vlgmr.msra.gmra.mxu2 %v1388_v49 }
  0x54   : > { %760 = vmatmul.bf16.vlgmr.msra.gmra.mxu1 %v1372_v48  ;;  %840 = vmatmul.bf16.vlgmr.msra.gmra.mxu3 %v1388_v49 }
  0x63   : > { %596 = vmatmul.bf16.gmra.mxu0 %v1373_v50  ;;  %676 = vmatmul.bf16.gmra.mxu2 %v1389_v51 }
  0x64   : > { %765 = vmatmul.bf16.gmra.mxu1 %v1373_v50  ;;  %845 = vmatmul.bf16.gmra.mxu3 %v1389_v51 }
  0x73   : > { %601 = vmatmul.bf16.gmra.mxu0 %v1374_v52  ;;  %681 = vmatmul.bf16.gmra.mxu2 %v1390_v53 }
  0x74   : > { %770 = vmatmul.bf16.gmra.mxu1 %v1374_v52  ;;  %850 = vmatmul.bf16.gmra.mxu3 %v1390_v53 }
  0x83   : > { %606 = vmatmul.bf16.gmra.mxu0 %v1375_v54  ;;  %686 = vmatmul.bf16.gmra.mxu2 %v1391_v55 }
  0x84   : > { %775 = vmatmul.bf16.gmra.mxu1 %v1375_v54  ;;  %855 = vmatmul.bf16.gmra.mxu3 %v1391_v55 }
  0x93   : > { %611 = vmatmul.bf16.gmra.mxu0 %v1376_v56  ;;  %691 = vmatmul.bf16.gmra.mxu2 %v1392_v57 }
  0x94   : > { %780 = vmatmul.bf16.gmra.mxu1 %v1376_v56  ;;  %860 = vmatmul.bf16.gmra.mxu3 %v1392_v57  ;;  %v1383_v56 = vld [vmem:[%s1801_s30 + $0x58] sm:$0xff] }
  0x95   : > { %v1399_v57 = vld [vmem:[%s1801_s30 + $0xd8] sm:$0xff] }
  0xa3   : > { %616 = vmatmul.bf16.gmra.mxu0 %v1377_v58  ;;  %696 = vmatmul.bf16.gmra.mxu2 %v1393_v59 }
  0xa4   : > { %785 = vmatmul.bf16.gmra.mxu1 %v1377_v58  ;;  %865 = vmatmul.bf16.gmra.mxu3 %v1393_v59 }
  0xb3   : > { %621 = vmatmul.bf16.gmra.mxu0 %v1378_v60  ;;  %701 = vmatmul.bf16.gmra.mxu2 %v1394_v61 }
  0xb4   : > { %790 = vmatmul.bf16.gmra.mxu1 %v1378_v60  ;;  %870 = vmatmul.bf16.gmra.mxu3 %v1394_v61 }
  0xc3   : > { %626 = vmatmul.bf16.gmra.mxu0 %v1379_v62  ;;  %706 = vmatmul.bf16.gmra.mxu2 %v1395_v63 }
  0xc4   : > { %795 = vmatmul.bf16.gmra.mxu1 %v1379_v62  ;;  %875 = vmatmul.bf16.gmra.mxu3 %v1395_v63 }
  0xd0   : > { %v592_v5 = vpop.f32.mrf.mxu0 }
  0xd1   : > { %v593_v6 = vadd.f32 %v592_v5, %v1828_v1  ;;  %v761_v7 = vpop.f32.mrf.mxu1 }
  0xd2   : > { %v762_v8 = vadd.f32 %v761_v7, %v1830_v2 }
  0xd3   : > { %921 = vst [vmem:[%s1836_s23] sm:$0xff] %v593_v6  ;;  %631 = vmatmul.bf16.gmra.mxu0 %v1380_v3  ;;  %711 = vmatmul.bf16.gmra.mxu2 %v1396_v4 }
  0xd4   : > { %922 = vst [vmem:[%s1836_s23 + $0x8] sm:$0xff] %v762_v8  ;;  %800 = vmatmul.bf16.gmra.mxu1 %v1380_v3  ;;  %880 = vmatmul.bf16.gmra.mxu3 %v1396_v4 }
  0xd6   : > { %v672_v9 = vpop.f32.mrf.mxu2 }
  0xd7   : > { %v673_v10 = vadd.f32 %v672_v9, %v1828_v1  ;;  %v841_v11 = vpop.f32.mrf.mxu3 }
  0xd8   : > { %v842_v12 = vadd.f32 %v841_v11, %v1830_v2  ;;  %v594_v13 = vpop.f32.mrf.mxu0 }
  0xd9   : > { %985 = vst [vmem:[%s1836_s23 + $0x200] sm:$0xff] %v673_v10  ;;  %v595_v14 = vadd.f32 %v594_v13, %v1828_v1  ;;  %v763_v15 = vpop.f32.mrf.mxu1  ;;  %v1400_v13 = vld [vmem:[%s1801_s30 + $0xe0] sm:$0xff] }
  0xda   : > { %986 = vst [vmem:[%s1836_s23 + $0x208] sm:$0xff] %v842_v12  ;;  %v764_v16 = vadd.f32 %v763_v15, %v1830_v2  ;;  %v1384_v12 = vld [vmem:[%s1801_s30 + $0x60] sm:$0xff] }
  0xdb   : > { %923 = vst [vmem:[%s1836_s23 + $0x10] sm:$0xff] %v595_v14 }
  0xdc   : > { %924 = vst [vmem:[%s1836_s23 + $0x18] sm:$0xff] %v764_v16 }
  0xde   : > { %v674_v17 = vpop.f32.mrf.mxu2 }
  0xdf   : > { %v675_v18 = vadd.f32 %v674_v17, %v1828_v1  ;;  %v843_v19 = vpop.f32.mrf.mxu3 }
  0xe0   : > { %v844_v22 = vadd.f32 %v843_v19, %v1830_v2  ;;  %v597_v23 = vpop.f32.mrf.mxu0 }
  0xe1   : > { %987 = vst [vmem:[%s1836_s23 + $0x210] sm:$0xff] %v675_v18  ;;  %v598_v24 = vadd.f32 %v597_v23, %v1828_v1  ;;  %v766_v25 = vpop.f32.mrf.mxu1 }
  0xe2   : > { %988 = vst [vmem:[%s1836_s23 + $0x218] sm:$0xff] %v844_v22  ;;  %v767_v26 = vadd.f32 %v766_v25, %v1830_v2 }
  0xe3   : > { %925 = vst [vmem:[%s1836_s23 + $0x20] sm:$0xff] %v598_v24  ;;  %636 = vmatmul.bf16.gmra.mxu0 %v1381_v20  ;;  %716 = vmatmul.bf16.gmra.mxu2 %v1397_v21 }
  0xe4   : > { %926 = vst [vmem:[%s1836_s23 + $0x28] sm:$0xff] %v767_v26  ;;  %805 = vmatmul.bf16.gmra.mxu1 %v1381_v20  ;;  %885 = vmatmul.bf16.gmra.mxu3 %v1397_v21 }
  0xe6   : > { %v677_v27 = vpop.f32.mrf.mxu2 }
  0xe7   : > { %v678_v28 = vadd.f32 %v677_v27, %v1828_v1  ;;  %v846_v29 = vpop.f32.mrf.mxu3 }
  0xe8   : > { %v847_v30 = vadd.f32 %v846_v29, %v1830_v2  ;;  %v599_v31 = vpop.f32.mrf.mxu0 }
  0xe9   : > { %989 = vst [vmem:[%s1836_s23 + $0x220] sm:$0xff] %v678_v28  ;;  %v600_v32 = vadd.f32 %v599_v31, %v1828_v1  ;;  %v768_v33 = vpop.f32.mrf.mxu1  ;;  %v1401_v31 = vld [vmem:[%s1801_s30 + $0xe8] sm:$0xff] }
  0xea   : > { %990 = vst [vmem:[%s1836_s23 + $0x228] sm:$0xff] %v847_v30  ;;  %v769_v34 = vadd.f32 %v768_v33, %v1830_v2  ;;  %v1385_v30 = vld [vmem:[%s1801_s30 + $0x68] sm:$0xff] }
  0xeb   : > { %927 = vst [vmem:[%s1836_s23 + $0x30] sm:$0xff] %v600_v32 }
  0xec   : > { %928 = vst [vmem:[%s1836_s23 + $0x38] sm:$0xff] %v769_v34 }
  0xee   : > { %v679_v35 = vpop.f32.mrf.mxu2 }
  0xef   : > { %v680_v36 = vadd.f32 %v679_v35, %v1828_v1  ;;  %v848_v37 = vpop.f32.mrf.mxu3 }
  0xf0   : > { %v849_v40 = vadd.f32 %v848_v37, %v1830_v2  ;;  %v602_v41 = vpop.f32.mrf.mxu0 }
  0xf1   : > { %991 = vst [vmem:[%s1836_s23 + $0x230] sm:$0xff] %v680_v36  ;;  %v603_v42 = vadd.f32 %v602_v41, %v1828_v1  ;;  %v771_v43 = vpop.f32.mrf.mxu1 }
  0xf2   : > { %992 = vst [vmem:[%s1836_s23 + $0x238] sm:$0xff] %v849_v40  ;;  %v772_v44 = vadd.f32 %v771_v43, %v1830_v2 }
  0xf3   : > { %929 = vst [vmem:[%s1836_s23 + $0x40] sm:$0xff] %v603_v42  ;;  %641 = vmatmul.bf16.gmra.mxu0 %v1382_v38  ;;  %721 = vmatmul.bf16.gmra.mxu2 %v1398_v39 }
  0xf4   : > { %930 = vst [vmem:[%s1836_s23 + $0x48] sm:$0xff] %v772_v44  ;;  %810 = vmatmul.bf16.gmra.mxu1 %v1382_v38  ;;  %890 = vmatmul.bf16.gmra.mxu3 %v1398_v39 }
  0xf6   : > { %v682_v45 = vpop.f32.mrf.mxu2 }
  0xf7   : > { %v683_v46 = vadd.f32 %v682_v45, %v1828_v1  ;;  %v851_v47 = vpop.f32.mrf.mxu3 }
  0xf8   : > { %v852_v48 = vadd.f32 %v851_v47, %v1830_v2  ;;  %v604_v49 = vpop.f32.mrf.mxu0 }
  0xf9   : > { %993 = vst [vmem:[%s1836_s23 + $0x240] sm:$0xff] %v683_v46  ;;  %v605_v50 = vadd.f32 %v604_v49, %v1828_v1  ;;  %v773_v51 = vpop.f32.mrf.mxu1  ;;  %v1402_v49 = vld [vmem:[%s1801_s30 + $0xf0] sm:$0xff] }
  0xfa   : > { %994 = vst [vmem:[%s1836_s23 + $0x248] sm:$0xff] %v852_v48  ;;  %v774_v52 = vadd.f32 %v773_v51, %v1830_v2  ;;  %v1386_v48 = vld [vmem:[%s1801_s30 + $0x70] sm:$0xff] }
  0xfb   : > { %931 = vst [vmem:[%s1836_s23 + $0x50] sm:$0xff] %v605_v50 }
  0xfc   : > { %932 = vst [vmem:[%s1836_s23 + $0x58] sm:$0xff] %v774_v52 }
  0xfe   : > { %v684_v53 = vpop.f32.mrf.mxu2 }
  0xff   : > { %v685_v54 = vadd.f32 %v684_v53, %v1828_v1  ;;  %v853_v55 = vpop.f32.mrf.mxu3 }
 0x100   : > { %v854_v58 = vadd.f32 %v853_v55, %v1830_v2  ;;  %v607_v59 = vpop.f32.mrf.mxu0 }
 0x101   : > { %995 = vst [vmem:[%s1836_s23 + $0x250] sm:$0xff] %v685_v54  ;;  %v608_v60 = vadd.f32 %v607_v59, %v1828_v1  ;;  %v776_v61 = vpop.f32.mrf.mxu1 }
 0x102   : > { %996 = vst [vmem:[%s1836_s23 + $0x258] sm:$0xff] %v854_v58  ;;  %v777_v62 = vadd.f32 %v776_v61, %v1830_v2 }
 0x103   : > { %933 = vst [vmem:[%s1836_s23 + $0x60] sm:$0xff] %v608_v60  ;;  %646 = vmatmul.bf16.gmra.mxu0 %v1383_v56  ;;  %726 = vmatmul.bf16.gmra.mxu2 %v1399_v57 }
 0x104   : > { %934 = vst [vmem:[%s1836_s23 + $0x68] sm:$0xff] %v777_v62  ;;  %815 = vmatmul.bf16.gmra.mxu1 %v1383_v56  ;;  %895 = vmatmul.bf16.gmra.mxu3 %v1399_v57 }
 0x106   : > { %v687_v63 = vpop.f32.mrf.mxu2 }
 0x107   : > { %v688_v0 = vadd.f32 %v687_v63, %v1828_v1  ;;  %v856_v3 = vpop.f32.mrf.mxu3 }
 0x108   : > { %v857_v4 = vadd.f32 %v856_v3, %v1830_v2  ;;  %v609_v5 = vpop.f32.mrf.mxu0 }
 0x109   : > { %997 = vst [vmem:[%s1836_s23 + $0x260] sm:$0xff] %v688_v0  ;;  %v610_v6 = vadd.f32 %v609_v5, %v1828_v1  ;;  %v778_v7 = vpop.f32.mrf.mxu1  ;;  %v1403_v5 = vld [vmem:[%s1801_s30 + $0xf8] sm:$0xff] }
 0x10a   : > { %998 = vst [vmem:[%s1836_s23 + $0x268] sm:$0xff] %v857_v4  ;;  %v779_v8 = vadd.f32 %v778_v7, %v1830_v2  ;;  %v1387_v4 = vld [vmem:[%s1801_s30 + $0x78] sm:$0xff] }
 0x10b   : > { %935 = vst [vmem:[%s1836_s23 + $0x70] sm:$0xff] %v610_v6 }
 0x10c   : > { %936 = vst [vmem:[%s1836_s23 + $0x78] sm:$0xff] %v779_v8 }
 0x10e   : > { %v689_v9 = vpop.f32.mrf.mxu2 }
 0x10f   : > { %v690_v10 = vadd.f32 %v689_v9, %v1828_v1  ;;  %v858_v11 = vpop.f32.mrf.mxu3 }
 0x110   : > { %v859_v14 = vadd.f32 %v858_v11, %v1830_v2  ;;  %v612_v15 = vpop.f32.mrf.mxu0 }
 0x111   : > { %999 = vst [vmem:[%s1836_s23 + $0x270] sm:$0xff] %v690_v10  ;;  %v613_v16 = vadd.f32 %v612_v15, %v1828_v1  ;;  %v781_v17 = vpop.f32.mrf.mxu1 }
 0x112   : > { %1000 = vst [vmem:[%s1836_s23 + $0x278] sm:$0xff] %v859_v14  ;;  %v782_v18 = vadd.f32 %v781_v17, %v1830_v2 }
 0x113   : > { %937 = vst [vmem:[%s1836_s23 + $0x80] sm:$0xff] %v613_v16  ;;  %651 = vmatmul.bf16.gmra.mxu0 %v1384_v12  ;;  %731 = vmatmul.bf16.gmra.mxu2 %v1400_v13 }
 0x114   : > { %938 = vst [vmem:[%s1836_s23 + $0x88] sm:$0xff] %v782_v18  ;;  %820 = vmatmul.bf16.gmra.mxu1 %v1384_v12  ;;  %900 = vmatmul.bf16.gmra.mxu3 %v1400_v13 }
 0x116   : > { %v692_v19 = vpop.f32.mrf.mxu2 }
 0x117   : > { %v693_v20 = vadd.f32 %v692_v19, %v1828_v1  ;;  %v861_v21 = vpop.f32.mrf.mxu3 }
 0x118   : > { %v862_v22 = vadd.f32 %v861_v21, %v1830_v2  ;;  %v614_v23 = vpop.f32.mrf.mxu0 }
 0x119   : > { %1001 = vst [vmem:[%s1836_s23 + $0x280] sm:$0xff] %v693_v20  ;;  %v615_v24 = vadd.f32 %v614_v23, %v1828_v1  ;;  %v783_v25 = vpop.f32.mrf.mxu1 }
 0x11a   : > { %1002 = vst [vmem:[%s1836_s23 + $0x288] sm:$0xff] %v862_v22  ;;  %v784_v26 = vadd.f32 %v783_v25, %v1830_v2 }
 0x11b   : > { %939 = vst [vmem:[%s1836_s23 + $0x90] sm:$0xff] %v615_v24 }
 0x11c   : > { %940 = vst [vmem:[%s1836_s23 + $0x98] sm:$0xff] %v784_v26 }
 0x11e   : > { %v694_v27 = vpop.f32.mrf.mxu2 }
 0x11f   : > { %v695_v28 = vadd.f32 %v694_v27, %v1828_v1  ;;  %v863_v29 = vpop.f32.mrf.mxu3 }
 0x120   : > { %v864_v32 = vadd.f32 %v863_v29, %v1830_v2  ;;  %v617_v33 = vpop.f32.mrf.mxu0 }
 0x121   : > { %1003 = vst [vmem:[%s1836_s23 + $0x290] sm:$0xff] %v695_v28  ;;  %v618_v34 = vadd.f32 %v617_v33, %v1828_v1  ;;  %v786_v35 = vpop.f32.mrf.mxu1 }
 0x122   : > { %1004 = vst [vmem:[%s1836_s23 + $0x298] sm:$0xff] %v864_v32  ;;  %v787_v36 = vadd.f32 %v786_v35, %v1830_v2 }
 0x123   : > { %941 = vst [vmem:[%s1836_s23 + $0xa0] sm:$0xff] %v618_v34  ;;  %656 = vmatmul.bf16.gmra.mxu0 %v1385_v30  ;;  %736 = vmatmul.bf16.gmra.mxu2 %v1401_v31 }
 0x124   : > { %942 = vst [vmem:[%s1836_s23 + $0xa8] sm:$0xff] %v787_v36  ;;  %825 = vmatmul.bf16.gmra.mxu1 %v1385_v30  ;;  %905 = vmatmul.bf16.gmra.mxu3 %v1401_v31 }
 0x126   : > { %v697_v37 = vpop.f32.mrf.mxu2 }
 0x127   : > { %v698_v38 = vadd.f32 %v697_v37, %v1828_v1  ;;  %v866_v39 = vpop.f32.mrf.mxu3 }
 0x128   : > { %v867_v40 = vadd.f32 %v866_v39, %v1830_v2  ;;  %v619_v41 = vpop.f32.mrf.mxu0 }
 0x129   : > { %1005 = vst [vmem:[%s1836_s23 + $0x2a0] sm:$0xff] %v698_v38  ;;  %v620_v42 = vadd.f32 %v619_v41, %v1828_v1  ;;  %v788_v43 = vpop.f32.mrf.mxu1 }
 0x12a   : > { %1006 = vst [vmem:[%s1836_s23 + $0x2a8] sm:$0xff] %v867_v40  ;;  %v789_v44 = vadd.f32 %v788_v43, %v1830_v2 }
 0x12b   : > { %943 = vst [vmem:[%s1836_s23 + $0xb0] sm:$0xff] %v620_v42 }
 0x12c   : > { %944 = vst [vmem:[%s1836_s23 + $0xb8] sm:$0xff] %v789_v44 }
 0x12e   : > { %v699_v45 = vpop.f32.mrf.mxu2 }
 0x12f   : > { %v700_v46 = vadd.f32 %v699_v45, %v1828_v1  ;;  %v868_v47 = vpop.f32.mrf.mxu3 }
 0x130   : > { %v869_v50 = vadd.f32 %v868_v47, %v1830_v2  ;;  %v622_v51 = vpop.f32.mrf.mxu0 }
 0x131   : > { %1007 = vst [vmem:[%s1836_s23 + $0x2b0] sm:$0xff] %v700_v46  ;;  %v623_v52 = vadd.f32 %v622_v51, %v1828_v1  ;;  %v791_v53 = vpop.f32.mrf.mxu1 }
 0x132   : > { %1008 = vst [vmem:[%s1836_s23 + $0x2b8] sm:$0xff] %v869_v50  ;;  %v792_v54 = vadd.f32 %v791_v53, %v1830_v2 }
 0x133   : > { %945 = vst [vmem:[%s1836_s23 + $0xc0] sm:$0xff] %v623_v52  ;;  %661 = vmatmul.bf16.gmra.mxu0 %v1386_v48  ;;  %741 = vmatmul.bf16.gmra.mxu2 %v1402_v49 }
 0x134   : > { %946 = vst [vmem:[%s1836_s23 + $0xc8] sm:$0xff] %v792_v54  ;;  %830 = vmatmul.bf16.gmra.mxu1 %v1386_v48  ;;  %910 = vmatmul.bf16.gmra.mxu3 %v1402_v49 }
 0x136   : > { %v702_v55 = vpop.f32.mrf.mxu2 }
 0x137   : > { %v703_v56 = vadd.f32 %v702_v55, %v1828_v1  ;;  %v871_v57 = vpop.f32.mrf.mxu3 }
 0x138   : > { %v872_v58 = vadd.f32 %v871_v57, %v1830_v2  ;;  %v624_v59 = vpop.f32.mrf.mxu0 }
 0x139   : > { %1009 = vst [vmem:[%s1836_s23 + $0x2c0] sm:$0xff] %v703_v56  ;;  %v625_v60 = vadd.f32 %v624_v59, %v1828_v1  ;;  %v793_v61 = vpop.f32.mrf.mxu1 }
 0x13a   : > { %1010 = vst [vmem:[%s1836_s23 + $0x2c8] sm:$0xff] %v872_v58  ;;  %v794_v62 = vadd.f32 %v793_v61, %v1830_v2 }
 0x13b   : > { %947 = vst [vmem:[%s1836_s23 + $0xd0] sm:$0xff] %v625_v60 }
 0x13c   : > { %948 = vst [vmem:[%s1836_s23 + $0xd8] sm:$0xff] %v794_v62 }
 0x13e   : > { %v704_v63 = vpop.f32.mrf.mxu2 }
 0x13f   : > { %v705_v0 = vadd.f32 %v704_v63, %v1828_v1  ;;  %v873_v3 = vpop.f32.mrf.mxu3 }
 0x140   : > { %v874_v6 = vadd.f32 %v873_v3, %v1830_v2  ;;  %v627_v7 = vpop.f32.mrf.mxu0 }
 0x141   : > { %1011 = vst [vmem:[%s1836_s23 + $0x2d0] sm:$0xff] %v705_v0  ;;  %v628_v8 = vadd.f32 %v627_v7, %v1828_v1  ;;  %v796_v9 = vpop.f32.mrf.mxu1 }
 0x142   : > { %1012 = vst [vmem:[%s1836_s23 + $0x2d8] sm:$0xff] %v874_v6  ;;  %v797_v10 = vadd.f32 %v796_v9, %v1830_v2 }
 0x143   : > { %949 = vst [vmem:[%s1836_s23 + $0xe0] sm:$0xff] %v628_v8  ;;  %666 = vmatmul.bf16.gmra.mxu0 %v1387_v4  ;;  %746 = vmatmul.bf16.gmra.mxu2 %v1403_v5 }
 0x144   : > { %950 = vst [vmem:[%s1836_s23 + $0xe8] sm:$0xff] %v797_v10  ;;  %835 = vmatmul.bf16.gmra.mxu1 %v1387_v4  ;;  %915 = vmatmul.bf16.gmra.mxu3 %v1403_v5 }
 0x146   : > { %v707_v11 = vpop.f32.mrf.mxu2 }
 0x147   : > { %v708_v12 = vadd.f32 %v707_v11, %v1828_v1  ;;  %v876_v13 = vpop.f32.mrf.mxu3 }
 0x148   : > { %v877_v14 = vadd.f32 %v876_v13, %v1830_v2  ;;  %v629_v15 = vpop.f32.mrf.mxu0 }
 0x149   : > { %1013 = vst [vmem:[%s1836_s23 + $0x2e0] sm:$0xff] %v708_v12  ;;  %v630_v16 = vadd.f32 %v629_v15, %v1828_v1  ;;  %v798_v17 = vpop.f32.mrf.mxu1 }
 0x14a   : > { %1014 = vst [vmem:[%s1836_s23 + $0x2e8] sm:$0xff] %v877_v14  ;;  %v799_v18 = vadd.f32 %v798_v17, %v1830_v2 }
 0x14b   : > { %951 = vst [vmem:[%s1836_s23 + $0xf0] sm:$0xff] %v630_v16 }
 0x14c   : > { %952 = vst [vmem:[%s1836_s23 + $0xf8] sm:$0xff] %v799_v18 }
 0x14e   : > { %v709_v19 = vpop.f32.mrf.mxu2 }
 0x14f   : > { %v710_v20 = vadd.f32 %v709_v19, %v1828_v1  ;;  %v878_v21 = vpop.f32.mrf.mxu3 }
 0x150   : > { %v879_v22 = vadd.f32 %v878_v21, %v1830_v2  ;;  %v632_v23 = vpop.f32.mrf.mxu0 }
 0x151   : > { %1015 = vst [vmem:[%s1836_s23 + $0x2f0] sm:$0xff] %v710_v20  ;;  %v633_v24 = vadd.f32 %v632_v23, %v1828_v1  ;;  %v801_v25 = vpop.f32.mrf.mxu1 }
 0x152   : > { %1016 = vst [vmem:[%s1836_s23 + $0x2f8] sm:$0xff] %v879_v22  ;;  %v802_v26 = vadd.f32 %v801_v25, %v1830_v2 }
 0x153   : > { %953 = vst [vmem:[%s1836_s23 + $0x100] sm:$0xff] %v633_v24 }
 0x154   : > { %954 = vst [vmem:[%s1836_s23 + $0x108] sm:$0xff] %v802_v26 }
 0x156   : > { %v712_v27 = vpop.f32.mrf.mxu2 }
 0x157   : > { %v713_v28 = vadd.f32 %v712_v27, %v1828_v1  ;;  %v881_v29 = vpop.f32.mrf.mxu3 }
 0x158   : > { %v882_v30 = vadd.f32 %v881_v29, %v1830_v2  ;;  %v634_v31 = vpop.f32.mrf.mxu0 }
 0x159   : > { %1017 = vst [vmem:[%s1836_s23 + $0x300] sm:$0xff] %v713_v28  ;;  %v635_v32 = vadd.f32 %v634_v31, %v1828_v1  ;;  %v803_v33 = vpop.f32.mrf.mxu1 }
 0x15a   : > { %1018 = vst [vmem:[%s1836_s23 + $0x308] sm:$0xff] %v882_v30  ;;  %v804_v34 = vadd.f32 %v803_v33, %v1830_v2 }
 0x15b   : > { %955 = vst [vmem:[%s1836_s23 + $0x110] sm:$0xff] %v635_v32 }
 0x15c   : > { %956 = vst [vmem:[%s1836_s23 + $0x118] sm:$0xff] %v804_v34 }
 0x15e   : > { %v714_v35 = vpop.f32.mrf.mxu2 }
 0x15f   : > { %v715_v36 = vadd.f32 %v714_v35, %v1828_v1  ;;  %v883_v37 = vpop.f32.mrf.mxu3 }
 0x160   : > { %v884_v38 = vadd.f32 %v883_v37, %v1830_v2  ;;  %v637_v39 = vpop.f32.mrf.mxu0 }
 0x161   : > { %1019 = vst [vmem:[%s1836_s23 + $0x310] sm:$0xff] %v715_v36  ;;  %v638_v40 = vadd.f32 %v637_v39, %v1828_v1  ;;  %v806_v41 = vpop.f32.mrf.mxu1 }
 0x162   : > { %1020 = vst [vmem:[%s1836_s23 + $0x318] sm:$0xff] %v884_v38  ;;  %v807_v42 = vadd.f32 %v806_v41, %v1830_v2 }
 0x163   : > { %957 = vst [vmem:[%s1836_s23 + $0x120] sm:$0xff] %v638_v40 }
 0x164   : > { %958 = vst [vmem:[%s1836_s23 + $0x128] sm:$0xff] %v807_v42 }
 0x166   : > { %v717_v43 = vpop.f32.mrf.mxu2 }
 0x167   : > { %v718_v44 = vadd.f32 %v717_v43, %v1828_v1  ;;  %v886_v45 = vpop.f32.mrf.mxu3 }
 0x168   : > { %v887_v46 = vadd.f32 %v886_v45, %v1830_v2  ;;  %v639_v47 = vpop.f32.mrf.mxu0 }
 0x169   : > { %1021 = vst [vmem:[%s1836_s23 + $0x320] sm:$0xff] %v718_v44  ;;  %v640_v48 = vadd.f32 %v639_v47, %v1828_v1  ;;  %v808_v49 = vpop.f32.mrf.mxu1 }
 0x16a   : > { %1022 = vst [vmem:[%s1836_s23 + $0x328] sm:$0xff] %v887_v46  ;;  %v809_v50 = vadd.f32 %v808_v49, %v1830_v2 }
 0x16b   : > { %959 = vst [vmem:[%s1836_s23 + $0x130] sm:$0xff] %v640_v48 }
 0x16c   : > { %960 = vst [vmem:[%s1836_s23 + $0x138] sm:$0xff] %v809_v50 }
 0x16e   : > { %v719_v51 = vpop.f32.mrf.mxu2 }
 0x16f   : > { %v720_v52 = vadd.f32 %v719_v51, %v1828_v1  ;;  %v888_v53 = vpop.f32.mrf.mxu3 }
 0x170   : > { %v889_v54 = vadd.f32 %v888_v53, %v1830_v2  ;;  %v642_v55 = vpop.f32.mrf.mxu0 }
 0x171   : > { %1023 = vst [vmem:[%s1836_s23 + $0x330] sm:$0xff] %v720_v52  ;;  %v643_v56 = vadd.f32 %v642_v55, %v1828_v1  ;;  %v811_v57 = vpop.f32.mrf.mxu1 }
 0x172   : > { %1024 = vst [vmem:[%s1836_s23 + $0x338] sm:$0xff] %v889_v54  ;;  %v812_v58 = vadd.f32 %v811_v57, %v1830_v2 }
 0x173   : > { %961 = vst [vmem:[%s1836_s23 + $0x140] sm:$0xff] %v643_v56 }
 0x174   : > { %962 = vst [vmem:[%s1836_s23 + $0x148] sm:$0xff] %v812_v58 }
 0x176   : > { %v722_v59 = vpop.f32.mrf.mxu2 }
 0x177   : > { %v723_v60 = vadd.f32 %v722_v59, %v1828_v1  ;;  %v891_v61 = vpop.f32.mrf.mxu3 }
 0x178   : > { %v892_v62 = vadd.f32 %v891_v61, %v1830_v2  ;;  %v644_v63 = vpop.f32.mrf.mxu0 }
 0x179   : > { %1025 = vst [vmem:[%s1836_s23 + $0x340] sm:$0xff] %v723_v60  ;;  %v645_v0 = vadd.f32 %v644_v63, %v1828_v1  ;;  %v813_v3 = vpop.f32.mrf.mxu1 }
 0x17a   : > { %1026 = vst [vmem:[%s1836_s23 + $0x348] sm:$0xff] %v892_v62  ;;  %v814_v4 = vadd.f32 %v813_v3, %v1830_v2 }
 0x17b   : > { %963 = vst [vmem:[%s1836_s23 + $0x150] sm:$0xff] %v645_v0 }
 0x17c   : > { %964 = vst [vmem:[%s1836_s23 + $0x158] sm:$0xff] %v814_v4 }
 0x17e   : > { %v724_v5 = vpop.f32.mrf.mxu2 }
 0x17f   : > { %v725_v6 = vadd.f32 %v724_v5, %v1828_v1  ;;  %v893_v7 = vpop.f32.mrf.mxu3 }
 0x180   : > { %v894_v8 = vadd.f32 %v893_v7, %v1830_v2  ;;  %v647_v9 = vpop.f32.mrf.mxu0 }
 0x181   : > { %1027 = vst [vmem:[%s1836_s23 + $0x350] sm:$0xff] %v725_v6  ;;  %v648_v10 = vadd.f32 %v647_v9, %v1828_v1  ;;  %v816_v11 = vpop.f32.mrf.mxu1 }
 0x182   : > { %1028 = vst [vmem:[%s1836_s23 + $0x358] sm:$0xff] %v894_v8  ;;  %v817_v12 = vadd.f32 %v816_v11, %v1830_v2 }
 0x183   : > { %965 = vst [vmem:[%s1836_s23 + $0x160] sm:$0xff] %v648_v10 }
 0x184   : > { %966 = vst [vmem:[%s1836_s23 + $0x168] sm:$0xff] %v817_v12 }
 0x186   : > { %v727_v13 = vpop.f32.mrf.mxu2 }
 0x187   : > { %v728_v14 = vadd.f32 %v727_v13, %v1828_v1  ;;  %v896_v15 = vpop.f32.mrf.mxu3 }
 0x188   : > { %v897_v16 = vadd.f32 %v896_v15, %v1830_v2  ;;  %v649_v17 = vpop.f32.mrf.mxu0 }
 0x189   : > { %1029 = vst [vmem:[%s1836_s23 + $0x360] sm:$0xff] %v728_v14  ;;  %v650_v18 = vadd.f32 %v649_v17, %v1828_v1  ;;  %v818_v19 = vpop.f32.mrf.mxu1 }
 0x18a   : > { %1030 = vst [vmem:[%s1836_s23 + $0x368] sm:$0xff] %v897_v16  ;;  %v819_v20 = vadd.f32 %v818_v19, %v1830_v2 }
 0x18b   : > { %967 = vst [vmem:[%s1836_s23 + $0x170] sm:$0xff] %v650_v18 }
 0x18c   : > { %968 = vst [vmem:[%s1836_s23 + $0x178] sm:$0xff] %v819_v20 }
 0x18e   : > { %v729_v21 = vpop.f32.mrf.mxu2 }
 0x18f   : > { %v730_v22 = vadd.f32 %v729_v21, %v1828_v1  ;;  %v898_v23 = vpop.f32.mrf.mxu3 }
 0x190   : > { %v899_v24 = vadd.f32 %v898_v23, %v1830_v2  ;;  %v652_v25 = vpop.f32.mrf.mxu0 }
 0x191   : > { %1031 = vst [vmem:[%s1836_s23 + $0x370] sm:$0xff] %v730_v22  ;;  %v653_v26 = vadd.f32 %v652_v25, %v1828_v1  ;;  %v821_v27 = vpop.f32.mrf.mxu1 }
 0x192   : > { %1032 = vst [vmem:[%s1836_s23 + $0x378] sm:$0xff] %v899_v24  ;;  %v822_v28 = vadd.f32 %v821_v27, %v1830_v2 }
 0x193   : > { %969 = vst [vmem:[%s1836_s23 + $0x180] sm:$0xff] %v653_v26 }
 0x194   : > { %970 = vst [vmem:[%s1836_s23 + $0x188] sm:$0xff] %v822_v28 }
 0x196   : > { %v732_v29 = vpop.f32.mrf.mxu2 }
 0x197   : > { %v733_v30 = vadd.f32 %v732_v29, %v1828_v1  ;;  %v901_v31 = vpop.f32.mrf.mxu3 }
 0x198   : > { %v902_v32 = vadd.f32 %v901_v31, %v1830_v2  ;;  %v654_v33 = vpop.f32.mrf.mxu0 }
 0x199   : > { %1033 = vst [vmem:[%s1836_s23 + $0x380] sm:$0xff] %v733_v30  ;;  %v655_v34 = vadd.f32 %v654_v33, %v1828_v1  ;;  %v823_v35 = vpop.f32.mrf.mxu1 }
 0x19a   : > { %1034 = vst [vmem:[%s1836_s23 + $0x388] sm:$0xff] %v902_v32  ;;  %v824_v36 = vadd.f32 %v823_v35, %v1830_v2 }
 0x19b   : > { %971 = vst [vmem:[%s1836_s23 + $0x190] sm:$0xff] %v655_v34 }
 0x19c   : > { %972 = vst [vmem:[%s1836_s23 + $0x198] sm:$0xff] %v824_v36 }
 0x19e   : > { %v734_v37 = vpop.f32.mrf.mxu2 }
 0x19f   : > { %v735_v38 = vadd.f32 %v734_v37, %v1828_v1  ;;  %v903_v39 = vpop.f32.mrf.mxu3 }
 0x1a0   : > { %v904_v40 = vadd.f32 %v903_v39, %v1830_v2  ;;  %v657_v41 = vpop.f32.mrf.mxu0 }
 0x1a1   : > { %1035 = vst [vmem:[%s1836_s23 + $0x390] sm:$0xff] %v735_v38  ;;  %v658_v42 = vadd.f32 %v657_v41, %v1828_v1  ;;  %v826_v43 = vpop.f32.mrf.mxu1 }
 0x1a2   : > { %1036 = vst [vmem:[%s1836_s23 + $0x398] sm:$0xff] %v904_v40  ;;  %v827_v44 = vadd.f32 %v826_v43, %v1830_v2 }
 0x1a3   : > { %973 = vst [vmem:[%s1836_s23 + $0x1a0] sm:$0xff] %v658_v42 }
 0x1a4   : > { %974 = vst [vmem:[%s1836_s23 + $0x1a8] sm:$0xff] %v827_v44 }
 0x1a6   : > { %v737_v45 = vpop.f32.mrf.mxu2 }
 0x1a7   : > { %v738_v46 = vadd.f32 %v737_v45, %v1828_v1  ;;  %v906_v47 = vpop.f32.mrf.mxu3 }
 0x1a8   : > { %v907_v48 = vadd.f32 %v906_v47, %v1830_v2  ;;  %v659_v49 = vpop.f32.mrf.mxu0 }
 0x1a9   : > { %1037 = vst [vmem:[%s1836_s23 + $0x3a0] sm:$0xff] %v738_v46  ;;  %v660_v50 = vadd.f32 %v659_v49, %v1828_v1  ;;  %v828_v51 = vpop.f32.mrf.mxu1 }
 0x1aa   : > { %1038 = vst [vmem:[%s1836_s23 + $0x3a8] sm:$0xff] %v907_v48  ;;  %v829_v52 = vadd.f32 %v828_v51, %v1830_v2 }
 0x1ab   : > { %975 = vst [vmem:[%s1836_s23 + $0x1b0] sm:$0xff] %v660_v50 }
 0x1ac   : > { %976 = vst [vmem:[%s1836_s23 + $0x1b8] sm:$0xff] %v829_v52 }
 0x1ae   : > { %v739_v53 = vpop.f32.mrf.mxu2 }
 0x1af   : > { %v740_v54 = vadd.f32 %v739_v53, %v1828_v1  ;;  %v908_v55 = vpop.f32.mrf.mxu3 }
 0x1b0   : > { %v909_v56 = vadd.f32 %v908_v55, %v1830_v2  ;;  %v662_v57 = vpop.f32.mrf.mxu0 }
 0x1b1   : > { %1039 = vst [vmem:[%s1836_s23 + $0x3b0] sm:$0xff] %v740_v54  ;;  %v663_v58 = vadd.f32 %v662_v57, %v1828_v1  ;;  %v831_v59 = vpop.f32.mrf.mxu1 }
 0x1b2   : > { %1040 = vst [vmem:[%s1836_s23 + $0x3b8] sm:$0xff] %v909_v56  ;;  %v832_v60 = vadd.f32 %v831_v59, %v1830_v2 }
 0x1b3   : > { %977 = vst [vmem:[%s1836_s23 + $0x1c0] sm:$0xff] %v663_v58 }
 0x1b4   : > { %978 = vst [vmem:[%s1836_s23 + $0x1c8] sm:$0xff] %v832_v60 }
 0x1b6   : > { %v742_v61 = vpop.f32.mrf.mxu2 }
 0x1b7   : > { %v743_v62 = vadd.f32 %v742_v61, %v1828_v1  ;;  %v911_v63 = vpop.f32.mrf.mxu3 }
 0x1b8   : > { %v912_v0 = vadd.f32 %v911_v63, %v1830_v2  ;;  %v664_v3 = vpop.f32.mrf.mxu0 }
 0x1b9   : > { %1041 = vst [vmem:[%s1836_s23 + $0x3c0] sm:$0xff] %v743_v62  ;;  %v665_v4 = vadd.f32 %v664_v3, %v1828_v1  ;;  %v833_v5 = vpop.f32.mrf.mxu1 }
 0x1ba   : > { %1042 = vst [vmem:[%s1836_s23 + $0x3c8] sm:$0xff] %v912_v0  ;;  %v834_v6 = vadd.f32 %v833_v5, %v1830_v2 }
 0x1bb   : > { %979 = vst [vmem:[%s1836_s23 + $0x1d0] sm:$0xff] %v665_v4 }
 0x1bc   : > { %980 = vst [vmem:[%s1836_s23 + $0x1d8] sm:$0xff] %v834_v6 }
 0x1be   : > { %v744_v7 = vpop.f32.mrf.mxu2 }
 0x1bf   : > { %v745_v8 = vadd.f32 %v744_v7, %v1828_v1  ;;  %v913_v9 = vpop.f32.mrf.mxu3 }
 0x1c0   : > { %v914_v10 = vadd.f32 %v913_v9, %v1830_v2  ;;  %v667_v11 = vpop.f32.mrf.mxu0 }
 0x1c1   : > { %1043 = vst [vmem:[%s1836_s23 + $0x3d0] sm:$0xff] %v745_v8  ;;  %v668_v12 = vadd.f32 %v667_v11, %v1828_v1  ;;  %v836_v13 = vpop.f32.mrf.mxu1 }
 0x1c2   : > { %1044 = vst [vmem:[%s1836_s23 + $0x3d8] sm:$0xff] %v914_v10  ;;  %v837_v14 = vadd.f32 %v836_v13, %v1830_v2 }
 0x1c3   : > { %981 = vst [vmem:[%s1836_s23 + $0x1e0] sm:$0xff] %v668_v12 }
 0x1c4   : > { %982 = vst [vmem:[%s1836_s23 + $0x1e8] sm:$0xff] %v837_v14 }
 0x1c6   : > { %v747_v15 = vpop.f32.mrf.mxu2 }
 0x1c7   : > { %v748_v16 = vadd.f32 %v747_v15, %v1828_v1  ;;  %v916_v17 = vpop.f32.mrf.mxu3 }
 0x1c8   : > { %v917_v18 = vadd.f32 %v916_v17, %v1830_v2  ;;  %v669_v19 = vpop.f32.mrf.mxu0 }
 0x1c9   : > { %1045 = vst [vmem:[%s1836_s23 + $0x3e0] sm:$0xff] %v748_v16  ;;  %v670_v20 = vadd.f32 %v669_v19, %v1828_v1  ;;  %v838_v21 = vpop.f32.mrf.mxu1 }
 0x1ca   : > { %1046 = vst [vmem:[%s1836_s23 + $0x3e8] sm:$0xff] %v917_v18  ;;  %v839_v22 = vadd.f32 %v838_v21, %v1830_v2 }
 0x1cb   : > { %983 = vst [vmem:[%s1836_s23 + $0x1f0] sm:$0xff] %v670_v20 }
 0x1cc   : > { %984 = vst [vmem:[%s1836_s23 + $0x1f8] sm:$0xff] %v839_v22 }
 0x1ce   : > { %v749_v23 = vpop.f32.mrf.mxu2 }
 0x1cf   : > { %v750_v24 = vadd.f32 %v749_v23, %v1828_v1  ;;  %v918_v25 = vpop.f32.mrf.mxu3 }
 0x1d0   : > { %v919_v26 = vadd.f32 %v918_v25, %v1830_v2 }
 0x1d1   : > { %1047 = vst [vmem:[%s1836_s23 + $0x3f0] sm:$0xff] %v750_v24 }
 0x1d2   : > { %1048 = vst [vmem:[%s1836_s23 + $0x3f8] sm:$0xff] %v919_v26 }
 0x1d3   : > { %1628 = shalt.err (!%p1625_p10)
}
 0x1d4   : > { %s1679_s22 = smov 256   ;;  %s1680_s25 = smov 16  }
 0x1d5   : > { %1448 = dma.vmem_to_hbm [thread:$0]  (%p1767_p3), %s1064_s16, 16384, %s1066_s4, %s1050_s5, %s1679_s22, %s1679_s22, %s1680_s25  }
 0x1d6 PF: > { %s1080_s30 = sand.u32 1, %s1659_s12   ;;  %p2149_p12 = scmp.ge.s32.totalorder %s1671_s15, 2 }
 0x1d7   : > { %s1081_s18 = scalar_lea.sflag [#allocation4], %s1080_s30 }
 0x1d8   : > { %p1462_p13 = pnand %p2149_p12, %p1736_p6 }
 0x1da   : > { %p1463_p0 = pneg %p1462_p13 }
 0x1dc   : > { %1654 = dma.done.wait (%p1463_p0), %s1081_s18, 16384  }
 0x1dd   : > { %1656 = vsyncadd (%p1463_p0), %s1081_s18, 4294950912  ;;  %p17_p5 = scmp.ge.s32.totalorder %s1757_s6, 4   ;;  %s2150_s12 = smov %s1663_s13 }
 0x1de   : > { %s2151_s13 = smov %s1667_s14  ;;  %s2152_s14 = smov %s1773_s10 }
 0x1df   : > { %s2153_s15 = smov %s1757_s6  ;;  %19 = sbr.rel (!%p17_p5) target bundleno = 6 (0x6), region = 85 }
 0x1e4   :  { %1087 = vsyncpa [#allocation3], 1 }
 0x1e5   :  { %1089 = vsyncpa [#allocation3 + $0x1], 1 }
 0x1e6   :  { %1090 = vsyncpa [#allocation6], 1 }
 0x1e7   :  { %1091 = vsyncpa [#allocation4], 1 }
 0x1e8   :  { %1093 = vsyncpa [#allocation4 + $0x1], 1 }

</bundles_post_ra>
